<compile_context>
chip_gen: v7x
topology: tpu7x:2x2x1
jax: 0.10.0
libtpu: 0.0.40
codegen_flags: <defaults>
</compile_context>

<pallas_src>
import jax
import jax.numpy as jnp
from jax.experimental import pallas as pl
from jax.experimental.pallas import tpu as pltpu

_TILE_BYTES = 4 * 1024 * 1024       # per-block target (~85% of HBM roofline)
_VMEM_LIMIT = 32 * 1024 * 1024      # 2 operands x 2 buffers x 4 MiB + slack


def _scale_kernel(scale_ref, x_ref, o_ref):
    # scale_ref: SMEM (1,) f32 parameter; x_ref / o_ref: VMEM tiles.
    o_ref[...] = x_ref[...] * scale_ref[0].astype(x_ref.dtype)


def _sublane_multiple(dtype):
    itemsize = jnp.dtype(dtype).itemsize
    return {1: 32, 2: 16}.get(itemsize, 8)


def _round_up(n, m):
    return ((n + m - 1) // m) * m


@jax.jit
def scale_layer(x, scale):
    """x: arbitrary-shaped array (e.g. NCHW); scale: scalar or (1,). Returns x * scale."""
    orig_shape = x.shape
    scale = jnp.asarray(scale, jnp.float32).reshape(1)
    total = x.size

    if total == 0:
        return x

    # Ragged totals fall back to a plain XLA multiply rather than paying an
    # extra full-tensor pad/copy pass for a bandwidth-bound op.
    # TODO(synk): handle the <128-element tail with a masked store instead.
    if total % 128 != 0:
        return x * scale[0].astype(x.dtype)

    # Lane-dense flat view. Any cols >= 128 gives unmasked full-lane stores and
    # contiguous per-block DMA; prefer a wider choice only to shrink the grid.
    cols = 128
    for c in (1024, 512, 256):
        if total % c == 0:
            cols = c
            break
    rows = total // cols
    x2d = x.reshape(rows, cols)   # contiguous reshape -> bitcast under jit

    # Row-tile: ~_TILE_BYTES per block, rounded to the dtype's sublane multiple.
    sub = _sublane_multiple(x.dtype)
    bytes_per_row = cols * jnp.dtype(x.dtype).itemsize
    tr = max(sub, ((_TILE_BYTES // bytes_per_row) // sub) * sub)
    tr = min(tr, rows)            # full-extent block is exempt from (8,128)
    # Give the v7x megacore >=2 grid steps when the tensor is big enough.
    if rows >= 2 * sub and pl.cdiv(rows, tr) < 2:
        tr = min(rows, _round_up(pl.cdiv(rows, 2), sub))

    grid = (pl.cdiv(rows, tr),)

    out2d = pl.pallas_call(
        _scale_kernel,
        out_shape=jax.ShapeDtypeStruct(x2d.shape, x2d.dtype),
        grid=grid,
        in_specs=[
            pl.BlockSpec(memory_space=pltpu.SMEM),       # (1,) f32 scalar
            pl.BlockSpec((tr, cols), lambda i: (i, 0)),  # lane-dense input tile
        ],
        out_specs=pl.BlockSpec((tr, cols), lambda i: (i, 0)),
        compiler_params=pltpu.CompilerParams(
            dimension_semantics=("parallel",),
            vmem_limit_bytes=_VMEM_LIMIT,
        ),
        cost_estimate=pl.CostEstimate(
            flops=total, transcendentals=0, bytes_accessed=2 * x.nbytes
        ),
    )(scale, x2d)

    return out2d.reshape(orig_shape)


if __name__ == "__main__":
    key = jax.random.PRNGKey(0)
    x = jax.random.normal(key, (2, 4, 16, 16), dtype=jnp.float32)

    # Matches nn.Parameter(torch.FloatTensor([0.25]))
    scale = jnp.array([0.25], dtype=jnp.float32)

    out = scale_layer(x, scale)
    out = jax.block_until_ready(out)

    ref = x * scale[0]

    assert out.shape == x.shape
    assert out.dtype == x.dtype
    assert jnp.allclose(out, ref, atol=1e-6, rtol=1e-6)

    print("KERNEL_OK")
</pallas_src>

<mosaic_0001>
module attributes {stable_mosaic.version = 11 : i64} {
  func.func @_scale_kernel(%arg0: i32, %arg1: memref<1xf32, #tpu.memory_space<smem>>, %arg2: memref<2x1024xf32, #tpu.memory_space<vmem>>, %arg3: memref<2x1024xf32, #tpu.memory_space<vmem>>) attributes {dimension_semantics = [#tpu.dimension_semantics<parallel>], iteration_bounds = array<i64: 1>, scalar_prefetch = 0 : i64, scratch_operands = 0 : i64, tpu.core_type = #tpu.core_type<tc>, window_params = [{transform_indices = @transform_0, window_bounds = array<i64: 1>}, {transform_indices = @transform_1, window_bounds = array<i64: 2, 1024>}, {transform_indices = @transform_2, window_bounds = array<i64: 2, 1024>}]} {
    %c0 = arith.constant 0 : index
    %c0_0 = arith.constant 0 : index
    %0 = vector.load %arg2[%c0, %c0_0] : memref<2x1024xf32, #tpu.memory_space<vmem>>, vector<2x1024xf32>
    %c0_1 = arith.constant 0 : index
    %1 = memref.load %arg1[%c0_1] : memref<1xf32, #tpu.memory_space<smem>>
    %2 = vector.broadcast %1 : f32 to vector<2x1024xf32>
    %3 = arith.mulf %0, %2 : vector<2x1024xf32>
    %c0_2 = arith.constant 0 : index
    %c0_3 = arith.constant 0 : index
    %4 = vector.load %arg3[%c0_2, %c0_3] : memref<2x1024xf32, #tpu.memory_space<vmem>>, vector<2x1024xf32>
    tpu.vector_store %arg3[%c0_2, %c0_3], %3 {strides = array<i32>} : memref<2x1024xf32, #tpu.memory_space<vmem>>, vector<2x1024xf32>,
    return
  }
  func.func @transform_0(%arg0: i32) -> i32 {
    %c0_i32 = arith.constant 0 : i32
    %c0_i32_0 = arith.constant 0 : i32
    return %c0_i32 : i32
  }
  func.func @transform_1(%arg0: i32) -> (i32, i32) {
    %c0_i32 = arith.constant 0 : i32
    %c0_i32_0 = arith.constant 0 : i32
    return %arg0, %c0_i32 : i32, i32
  }
  func.func @transform_2(%arg0: i32) -> (i32, i32) {
    %c0_i32 = arith.constant 0 : i32
    %c0_i32_0 = arith.constant 0 : i32
    return %arg0, %c0_i32 : i32, i32
  }
}

</mosaic_0001>

<bundles_post_ra>
// kernel: scale_layer.1
= control target key start
LH: loop header
LB: loop body
LE: loop exit
PB: predicated region body
PF: predicated region fallthrough
CT: control target
= control target key end

     0   :  { %s54_s0 = inlined_call_operand.<no memory space> [shape: f32[1], index: 0, kind: input, shape index: {}]   ;;  %s55_s1 = inlined_call_operand.vmem [shape: f32[2,1024], index: 1, kind: input, shape index: {}]   ;;  %s56_s2 = inlined_call_operand.vmem [shape: f32[2,1024], index: 2, kind: output, shape index: {}]  }
   0x1   :  { %v12_v0 = vld [vmem:[%s55_s1] sm:$0xff]  ;;  %v15_v1 = vstv %s54_s0  ;;  %v13_v2 = vld [vmem:[%s55_s1 + $0x8] sm:$0xff] }
   0x2   :  { %v16_v3 = vmul.f32 %v15_v1, %v12_v0  ;;  %v17_v4 = vmul.f32 %v15_v1, %v13_v2 }
   0x4   :  { %18 = vst [vmem:[%s56_s2] sm:$0xff] %v16_v3  ;;  %19 = vst [vmem:[%s56_s2 + $0x8] sm:$0xff] %v17_v4 }

</bundles_post_ra>
